<compile_context>
chip_gen: v5e
topology: v5e:2x2
jax: 0.10.0
libtpu: 0.0.40
codegen_flags: <defaults>
</compile_context>

<pallas_src>
import functools

import jax
import jax.numpy as jnp
from jax import lax
from jax.experimental import pallas as pl
from jax.experimental.pallas import tpu as pltpu

KERNEL_SIZE = 7
DILATION = 2
PAD = KERNEL_SIZE // 2 * DILATION        # = 6 -> output spatial size == input
NUM_TAPS = KERNEL_SIZE * KERNEL_SIZE     # 49


# ---------------------------------------------------------------------------
# Kernels
# ---------------------------------------------------------------------------
def _spatial_atten_mxu_kernel(x_ref, ma_ref, mm_ref, o_ref):
    """Dilated conv as two MXU matmuls against masked conv-operator matrices.

    x_ref : VMEM (TN, C, HW)  input block (native dtype)
    ma_ref: VMEM (HW, HW) f32 operator for the avg plane (1/C folded in)
    mm_ref: VMEM (HW, HW) f32 operator for the max plane
    o_ref : VMEM (TN, C, HW)
    """
    xv = x_ref[...]
    s = jnp.sum(xv, axis=1, dtype=jnp.float32)        # (TN, HW) channel sum
    mx = jnp.max(xv, axis=1).astype(jnp.float32)      # (TN, HW) channel max
    del xv                                            # don't keep x live across matmuls

    acc = jnp.dot(s, ma_ref[...], preferred_element_type=jnp.float32)
    acc = acc + jnp.dot(mx, mm_ref[...], preferred_element_type=jnp.float32)

    attn = jax.nn.sigmoid(acc).astype(o_ref.dtype)    # (TN, HW)
    # Re-read x from VMEM for the epilogue (cheap vld, avoids vreg spills).
    o_ref[...] = x_ref[...] * attn[:, None, :]        # broadcast over channels


def _spatial_atten_roll_kernel(x_ref, wa_ref, wm_ref, o_ref, *, H, W):
    """Fallback for very large HW: 49 lane-rolls, boundary masks folded into
    per-tap weight vectors (no selects / ANDs), 4-way split accumulators."""
    xv = x_ref[...]
    s = jnp.sum(xv, axis=1, dtype=jnp.float32)        # (TN, HW)
    mx = jnp.max(xv, axis=1).astype(jnp.float32)      # (TN, HW)
    del xv
    HW = H * W
    half = KERNEL_SIZE // 2

    accs = [jnp.zeros(s.shape, jnp.float32) for _ in range(4)]
    t = 0
    for i in range(KERNEL_SIZE):
        dy = (i - half) * DILATION
        for j in range(KERNEL_SIZE):
            dx = (j - half) * DILATION
            shift = (-(dy * W + dx)) % HW
            s_sh = pltpu.roll(s, shift=shift, axis=1) if shift else s
            m_sh = pltpu.roll(mx, shift=shift, axis=1) if shift else mx
            accs[t % 4] = accs[t % 4] + wa_ref[t] * s_sh + wm_ref[t] * m_sh
            t += 1
    acc = (accs[0] + accs[1]) + (accs[2] + accs[3])

    attn = jax.nn.sigmoid(acc).astype(o_ref.dtype)
    o_ref[...] = x_ref[...] * attn[:, None, :]


# ---------------------------------------------------------------------------
# Wrapper-side operator construction
# ---------------------------------------------------------------------------
def _tap_validity(H, W, dy, dx):
    p = jnp.arange(H * W)
    pr, pc = p // W, p % W
    qr, qc = pr + dy, pc + dx
    valid = (qr >= 0) & (qr < H) & (qc >= 0) & (qc < W)
    return valid, qr * W + qc


def _build_conv_operators(weight, C, H, W):
    """Dense masked conv operators so that acc = s @ m_avg + mx @ m_max."""
    HW = H * W
    w = weight.astype(jnp.float32)
    p = jnp.arange(HW)
    half = KERNEL_SIZE // 2
    m_avg = jnp.zeros((HW, HW), jnp.float32)
    m_max = jnp.zeros((HW, HW), jnp.float32)
    for i in range(KERNEL_SIZE):
        dy = (i - half) * DILATION
        for j in range(KERNEL_SIZE):
            dx = (j - half) * DILATION
            valid, q = _tap_validity(H, W, dy, dx)
            q = jnp.where(valid, q, 0)
            m_avg = m_avg.at[q, p].add(jnp.where(valid, w[0, 0, i, j] / C, 0.0))
            m_max = m_max.at[q, p].add(jnp.where(valid, w[0, 1, i, j], 0.0))
    return m_avg, m_max


def _build_masked_tap_weights(weight, C, H, W):
    """(49, HW) masked per-tap weight vectors for the roll fallback."""
    w = weight.astype(jnp.float32)
    half = KERNEL_SIZE // 2
    wa_rows, wm_rows = [], []
    for i in range(KERNEL_SIZE):
        dy = (i - half) * DILATION
        for j in range(KERNEL_SIZE):
            dx = (j - half) * DILATION
            valid, _ = _tap_validity(H, W, dy, dx)
            valid = valid.astype(jnp.float32)
            wa_rows.append(valid * (w[0, 0, i, j] / C))
            wm_rows.append(valid * w[0, 1, i, j])
    return jnp.stack(wa_rows), jnp.stack(wm_rows)


# ---------------------------------------------------------------------------
# Public wrapper
# ---------------------------------------------------------------------------
def spatial_atten(x, weight):
    """x: (N, C, H, W); weight: (1, 2, 7, 7) conv weight (no bias)."""
    N, C, H, W = x.shape
    HW = H * W
    # Lane-dense layout: flatten spatial so the last (lane) dim is H*W.
    x_flat = x.reshape(N, C, HW)
    itemsize = jnp.dtype(x.dtype).itemsize

    # --- generation-aware VMEM sizing ---------------------------------------
    try:
        info = pltpu.get_tpu_info()
        vmem_phys = getattr(info, "vmem_capacity_bytes", None) or (128 << 20)
    except Exception:
        vmem_phys = 64 << 20
    # ~96 MiB scoped limit on v5e/v6e (128 MiB physical), ~48 MiB on v7x (64 MiB).
    vmem_limit = int(min(int(vmem_phys), 128 << 20) * 3 // 4)
    budget = vmem_limit // 2        # headroom for pipelining / compiler temps

    # MXU path if the two dense (HW,HW) operators (double-buffered) fit easily.
    op_bytes_mxu = 2 * 2 * HW * HW * 4
    use_mxu = op_bytes_mxu <= budget // 2
    op_bytes = op_bytes_mxu if use_mxu else 2 * 2 * NUM_TAPS * HW * 4

    # Double-buffered in/out blocks + f32 temporaries (s, mx, acc, attn, ...).
    per_n = 4 * C * HW * itemsize + (C + 8) * HW * 4
    tn = int(max(1, min(N, (budget - op_bytes) // max(per_n, 1))))
    if N >= 2:
        tn = min(tn, N // 2)        # >= 2 grid steps -> both v7x TCs get work
    tn = max(tn, 1)
    while N % tn:                   # keep blocks uniform (exact divisor of N)
        tn -= 1

    x_spec = pl.BlockSpec((tn, C, HW), lambda n: (n, 0, 0))
    out_spec = pl.BlockSpec((tn, C, HW), lambda n: (n, 0, 0))
    # TODO(synk): if a v7x profile shows exposed DMA, add
    # pipeline_mode=pl.Buffered(3) to x_spec and re-budget VMEM accordingly.

    if use_mxu:
        m_avg, m_max = _build_conv_operators(weight, C, H, W)
        kernel = _spatial_atten_mxu_kernel
        operands = (x_flat, m_avg, m_max)
        in_specs = [
            x_spec,
            pl.BlockSpec((HW, HW), lambda n: (0, 0)),
            pl.BlockSpec((HW, HW), lambda n: (0, 0)),
        ]
        flops = N * HW * (2 * C + 4 * HW + 8) + N * C * HW
        bytes_accessed = 2 * N * C * HW * itemsize + 2 * HW * HW * 4
    else:
        wa, wm = _build_masked_tap_weights(weight, C, H, W)
        kernel = functools.partial(_spatial_atten_roll_kernel, H=H, W=W)
        operands = (x_flat, wa, wm)
        in_specs = [
            x_spec,
            pl.BlockSpec((NUM_TAPS, HW), lambda n: (0, 0)),
            pl.BlockSpec((NUM_TAPS, HW), lambda n: (0, 0)),
        ]
        flops = N * HW * (2 * C + 4 * NUM_TAPS + 8) + N * C * HW
        bytes_accessed = 2 * N * C * HW * itemsize + 2 * NUM_TAPS * HW * 4

    out = pl.pallas_call(
        kernel,
        out_shape=jax.ShapeDtypeStruct((N, C, HW), x.dtype),
        grid=(N // tn,),
        in_specs=in_specs,
        out_specs=out_spec,
        compiler_params=pltpu.CompilerParams(
            dimension_semantics=("parallel",),
            vmem_limit_bytes=vmem_limit,
        ),
        cost_estimate=pl.CostEstimate(
            flops=int(flops),
            transcendentals=int(N * HW),
            bytes_accessed=int(bytes_accessed),
        ),
    )(*operands)
    return out.reshape(N, C, H, W)


def spatial_atten_reference(x, weight):
    """Pure-JAX reference mirroring the PyTorch forward exactly."""
    avg = jnp.mean(x, axis=1, keepdims=True)
    mx = jnp.max(x, axis=1, keepdims=True)
    cat = jnp.concatenate([avg, mx], axis=1)
    out = lax.conv_general_dilated(
        cat, weight,
        window_strides=(1, 1),
        padding=((PAD, PAD), (PAD, PAD)),
        rhs_dilation=(DILATION, DILATION),
        dimension_numbers=("NCHW", "OIHW", "NCHW"),
        precision=lax.Precision.HIGHEST,
    )
    return x * jax.nn.sigmoid(out)


if __name__ == "__main__":
    key = jax.random.PRNGKey(0)
    kx, kw = jax.random.split(key)

    # Small shapes consistent with the module: batch=2, channels=4, spatial=16.
    N, C, H, W = 2, 4, 16, 16
    x = jax.random.normal(kx, (N, C, H, W), dtype=jnp.float32)

    # Conv2d(2, 1, 7, dilation=2, padding=6, bias=False): weight (1, 2, 7, 7).
    fan_in = 2 * KERNEL_SIZE * KERNEL_SIZE
    bound = 1.0 / float(fan_in) ** 0.5
    weight = jax.random.uniform(
        kw, (1, 2, KERNEL_SIZE, KERNEL_SIZE),
        dtype=jnp.float32, minval=-bound, maxval=bound)

    out = jax.block_until_ready(spatial_atten(x, weight))
    ref = spatial_atten_reference(x, weight)

    assert out.shape == ref.shape
    # Tolerance accounts for the conv running as an f32 matmul on the MXU
    # (multi-pass bf16 accumulation) vs. the HIGHEST-precision XLA reference.
    max_err = float(jnp.max(jnp.abs(out - ref)))
    assert jnp.allclose(out, ref, atol=5e-3, rtol=5e-3), max_err

    print("KERNEL_OK")
</pallas_src>

<mosaic_0001>
module attributes {stable_mosaic.version = 11 : i64} {
  func.func @_spatial_atten_mxu_kernel(%arg0: i32, %arg1: memref<1x4x256xf32, #tpu.memory_space<vmem>>, %arg2: memref<256x256xf32, #tpu.memory_space<vmem>>, %arg3: memref<256x256xf32, #tpu.memory_space<vmem>>, %arg4: memref<1x4x256xf32, #tpu.memory_space<vmem>>) attributes {dimension_semantics = [#tpu.dimension_semantics<parallel>], iteration_bounds = array<i64: 2>, scalar_prefetch = 0 : i64, scratch_operands = 0 : i64, tpu.core_type = #tpu.core_type<tc>, window_params = [{transform_indices = @transform_0, window_bounds = array<i64: 1, 4, 256>}, {pipeline_mode = #tpu.pipeline_mode<synchronous>, transform_indices = @transform_1, window_bounds = array<i64: 256, 256>}, {pipeline_mode = #tpu.pipeline_mode<synchronous>, transform_indices = @transform_2, window_bounds = array<i64: 256, 256>}, {transform_indices = @transform_3, window_bounds = array<i64: 1, 4, 256>}]} {
    %c0 = arith.constant 0 : index
    %c0_0 = arith.constant 0 : index
    %c0_1 = arith.constant 0 : index
    %0 = vector.load %arg1[%c0, %c0_0, %c0_1] : memref<1x4x256xf32, #tpu.memory_space<vmem>>, vector<1x4x256xf32>
    %cst = arith.constant dense<0.000000e+00> : vector<1x256xf32>
    %1 = vector.multi_reduction <add>, %0, %cst [1] : vector<1x4x256xf32> to vector<1x256xf32>
    %cst_2 = arith.constant dense<0xFF800000> : vector<1x256xf32>
    %2 = vector.multi_reduction <maximumf>, %0, %cst_2 [1] : vector<1x4x256xf32> to vector<1x256xf32>
    %c0_3 = arith.constant 0 : index
    %c0_4 = arith.constant 0 : index
    %3 = vector.load %arg2[%c0_3, %c0_4] : memref<256x256xf32, #tpu.memory_space<vmem>>, vector<256x256xf32>
    %cst_5 = arith.constant dense<0.000000e+00> : vector<1x256xf32>
    %4 = tpu.matmul %1, %3, %cst_5 {dimension_numbers = #tpu.dot_dimension_numbers<[1], [0], [0], [1], [0, 0, 1, 1], [], []>} : vector<1x256xf32>, vector<256x256xf32>, vector<1x256xf32> -> vector<1x256xf32>
    %c0_6 = arith.constant 0 : index
    %c0_7 = arith.constant 0 : index
    %5 = vector.load %arg3[%c0_6, %c0_7] : memref<256x256xf32, #tpu.memory_space<vmem>>, vector<256x256xf32>
    %cst_8 = arith.constant dense<0.000000e+00> : vector<1x256xf32>
    %6 = tpu.matmul %2, %5, %cst_8 {dimension_numbers = #tpu.dot_dimension_numbers<[1], [0], [0], [1], [0, 0, 1, 1], [], []>} : vector<1x256xf32>, vector<256x256xf32>, vector<1x256xf32> -> vector<1x256xf32>
    %7 = arith.addf %4, %6 : vector<1x256xf32>
    %8 = arith.negf %7 : vector<1x256xf32>
    %9 = math.exp %8 : vector<1x256xf32>
    %cst_9 = arith.constant 1.000000e+00 : f32
    %10 = vector.broadcast %cst_9 : f32 to vector<1x256xf32>
    %11 = arith.addf %10, %9 : vector<1x256xf32>
    %12 = arith.divf %10, %11 : vector<1x256xf32>
    %c0_10 = arith.constant 0 : index
    %c0_11 = arith.constant 0 : index
    %c0_12 = arith.constant 0 : index
    %13 = vector.load %arg1[%c0_10, %c0_11, %c0_12] : memref<1x4x256xf32, #tpu.memory_space<vmem>>, vector<1x4x256xf32>
    %14 = vector.shape_cast %12 : vector<1x256xf32> to vector<1x1x256xf32>
    %15 = vector.broadcast %14 : vector<1x1x256xf32> to vector<1x4x256xf32>
    %16 = arith.mulf %13, %15 : vector<1x4x256xf32>
    %c0_13 = arith.constant 0 : index
    %c0_14 = arith.constant 0 : index
    %c0_15 = arith.constant 0 : index
    %17 = vector.load %arg4[%c0_13, %c0_14, %c0_15] : memref<1x4x256xf32, #tpu.memory_space<vmem>>, vector<1x4x256xf32>
    tpu.vector_store %arg4[%c0_13, %c0_14, %c0_15], %16 {strides = array<i32>} : memref<1x4x256xf32, #tpu.memory_space<vmem>>, vector<1x4x256xf32>,
    return
  }
  func.func @transform_0(%arg0: i32) -> (i32, i32, i32) {
    %c0_i32 = arith.constant 0 : i32
    %c0_i32_0 = arith.constant 0 : i32
    %c0_i32_1 = arith.constant 0 : i32
    return %arg0, %c0_i32, %c0_i32_0 : i32, i32, i32
  }
  func.func @transform_1(%arg0: i32) -> (i32, i32) {
    %c0_i32 = arith.constant 0 : i32
    %c0_i32_0 = arith.constant 0 : i32
    %c0_i32_1 = arith.constant 0 : i32
    return %c0_i32, %c0_i32_0 : i32, i32
  }
  func.func @transform_2(%arg0: i32) -> (i32, i32) {
    %c0_i32 = arith.constant 0 : i32
    %c0_i32_0 = arith.constant 0 : i32
    %c0_i32_1 = arith.constant 0 : i32
    return %c0_i32, %c0_i32_0 : i32, i32
  }
  func.func @transform_3(%arg0: i32) -> (i32, i32, i32) {
    %c0_i32 = arith.constant 0 : i32
    %c0_i32_0 = arith.constant 0 : i32
    %c0_i32_1 = arith.constant 0 : i32
    return %arg0, %c0_i32, %c0_i32_0 : i32, i32, i32
  }
}

</mosaic_0001>

<bundles_post_ra>
// kernel: tpu_custom_call.1
= control target key start
LH: loop header
LB: loop body
LE: loop exit
PB: predicated region body
PF: predicated region fallthrough
CT: control target
= control target key end

     0   :  { %8 = vsyncpa [#allocation3], 0  ;;  %s1151_s0 = inlined_call_operand.hbm [shape: f32[2,4,256], index: 0, kind: input, shape index: {}]   ;;  %s1152_s1 = inlined_call_operand.hbm [shape: f32[256,256], index: 1, kind: input, shape index: {}]   ;;  %s1153_s2 = inlined_call_operand.hbm [shape: f32[256,256], index: 2, kind: input, shape index: {}]   ;;  %s1154_s3 = inlined_call_operand.hbm [shape: f32[2,4,256], index: 3, kind: output, shape index: {}]  }
   0x1   :  { %10 = vsyncpa [#allocation3 + $0x1], 0 }
   0x2   :  { %11 = vsyncpa [#allocation6], 0 }
   0x3   :  { %12 = vsyncpa [#allocation4], 0 }
   0x4   :  { %14 = vsyncpa [#allocation4 + $0x1], 0  ;;  %s989_s12 = smov 0   ;;  %s991_s13 = smov 0  }
   0x5   :  { %s993_s14 = smov 0   ;;  %s995_s15 = smov 0  }
   0x6 LB: > { %s130_s18 = sshll.u32 %s1152_s1, 4  ;;  %s1013_s19 = sadd.s32 4294967295, %s963_s15   ;;  %s963_s15 = sphi %s995_s15, %s1165_s15   ;;  %s959_s14 = sphi %s993_s14, %s1164_s14   ;;  %s955_s13 = sphi %s991_s13, %s1163_s13   ;;  %s951_s12 = sphi %s989_s12, %s1162_s12   ;;  %s131_s18 = int_to_ptr.hbm [resolvable:$true] %s130_s18 }
   0x7   : > { %p705_p0 = scmp.ge.s32.totalorder %s963_s15, 1  ;;  %p41_p1 = scmp.eq.s32.totalorder %s1013_s19, 0 }
   0x8   : > { %p119_p2 = scmp.lt.s32.totalorder %s963_s15, 3  ;;  %s965_s21 = smov [#allocation5]  }
   0x9   : > { %s132_s22 = sshll.u32 %s965_s21, 4  ;;  %s144_s25 = sshll.u32 %s1153_s2, 4  ;;  %s133_s22 = int_to_ptr.vmem [resolvable:$true] %s132_s22  ;;  %s145_s25 = int_to_ptr.hbm [resolvable:$true] %s144_s25 }
   0xa   : > { %p1018_p3 = pnand %p705_p0, %p119_p2  ;;  %s966_s26 = smov [#allocation7]  }
   0xb   : > { %s146_s27 = sshll.u32 %s966_s26, 4  ;;  %s967_s28 = smov 256   ;;  %s147_s27 = int_to_ptr.vmem [resolvable:$true] %s146_s27 }
   0xc   : > { %p738_p4 = pneg %p1018_p3  ;;  %s968_s29 = smov 16  }
   0xd   : > { %s704_s30 = sadd.s32 4294967294, %s963_s15   ;;  %s1032_s4 = sadd.s32 1, %s963_s15  }
   0xe   : > { %p739_p6 = pnand %p738_p4, %p41_p1  ;;  %s24_s5 = ssub.s32 %s963_s15, %s1032_s4 }
   0xf   : > { %s27_s6 = sadd.s32 1, %s959_s14  ;;  %p25_p7 = scmp.eq.s32.totalorder %s24_s5, 0 }
  0x10   : > { %741 = dma.hbm_to_vmem [thread:$0]  (!%p739_p6), %s131_s18, 8192, %s133_s22, [#allocation6], %s967_s28, %s967_s28, %s968_s29  }
  0x11   : > { %744 = dma.hbm_to_vmem [thread:$0]  (!%p739_p6), %s145_s25, 8192, %s147_s27, [#allocation6], %s967_s28, %s967_s28, %s968_s29  }
  0x12   : > { %p34_p8 = scmp.ne.s32.totalorder %s959_s14, %s955_s13  ;;  %p35_p9 = scmp.eq.s32.totalorder %s963_s15, 0 }
  0x13   : > { %p40_p10 = scmp.ne.s32.totalorder %s955_s13, %s951_s12  ;;  %p106_p13 = scmp.eq.s32.totalorder %s1013_s19, 1 }
  0x14   : > { %s1043_s7 = scalar_select %p25_p7, %s959_s14, %s27_s6  }
  0x15   : > { %p1045_p11 = por %p35_p9, %p34_p8  ;;  %p1051_p12 = por %p41_p1, %p40_p10 }
  0x16   : > { %p112_p0 = scmp.eq.s32.totalorder %s704_s30, 1  ;;  %p755_p2 = scmp.lt.s32.totalorder %s963_s15, 2 }
  0x17   : > { %s160_s10 = sand.u32 1, %s959_s14   ;;  %p1058_p4 = por %p106_p13, %p34_p8 }
  0x18   : > { %p1062_p6 = por %p112_p0, %p40_p10  ;;  %s709_s17 = sshll.u32 %s160_s10, 3 }
  0x19   : > { %s724_s18 = sshll.u32 %s963_s15, 3  ;;  %s164_s24 = scalar_lea.vmem [#allocation2], %s709_s17 }
  0x1a   : > { %s169_s23 = scalar_lea.hbm %s1151_s0, %s724_s18  ;;  %s173_s25 = sshll.u32 %s164_s24, 4  ;;  %s174_s25 = int_to_ptr.vmem [resolvable:$true] %s173_s25 }
  0x1b   : > { %s171_s26 = sshll.u32 %s169_s23, 4  ;;  %p1072_p7 = pnand %p755_p2, %p1045_p11  ;;  %s172_s26 = int_to_ptr.hbm [resolvable:$true] %s171_s26 }
  0x1c   : > { %s161_s28 = scalar_lea.sflag [#allocation3], %s160_s10  ;;  %s863_s29 = sshra.s32 %s172_s26, 4  ;;  %s864_s29 = int_to_ptr.hbm [resolvable:$true] %s863_s29 }
  0x1d   : > { %s865_s30 = scalar_lea.hbm %s864_s29, 8  ;;  %p867_p9 = pneg %p1072_p7 }
  0x1e   : > { %p866_p8 = scmp.ne.s32.totalorder %s864_s29, %s865_s30  ;;  %s870_s17 = scalar_lea.hbm %s1151_s0, 16 }
  0x1f   : > { %p871_p11 = scmp.lt.s32.totalorder %s864_s29, %s1151_s0  ;;  %p872_p0 = scmp.lt.s32.totalorder %s870_s17, %s865_s30 }
  0x20   : > { %p868_p10 = pnand %p867_p9, %p866_p8 }
  0x21   : > { %p873_p2 = por %p872_p0, %p871_p11 }
  0x22   : > { %p869_p13 = pneg %p868_p10 }
  0x24   : > { %p874_p5 = pnand %p873_p2, %p869_p13 }
  0x26   : > { %877 = shalt.err (!%p874_p5)
}
  0x27   : > { %748 = dma.hbm_to_vmem [thread:$0]  (!%p1072_p7), %s172_s26, 128, %s174_s25, %s161_s28  }
  0x28   : > { %182 = sbr.rel (%p1018_p3) target bundleno = 296 (0x128), region = 32  ;;  %s1089_s10 = sand.u32 (!%p1018_p3), 1, %s955_s13  }
  0x29   : > { %s713_s21 = sshll.u32 (!%p1018_p3), %s1089_s10, 3  ;;  %s185_s22 = scalar_lea.sflag (!%p1018_p3), [#allocation3], %s1089_s10 }
  0x2a   : > { %s1095_s23 = scalar_lea.vmem (!%p1018_p3), [#allocation2], %s713_s21 }
  0x2d   : > { %938 = dma.done.wait (%p1051_p12), %s185_s22, 128  }
  0x2e   : > { %940 = vsyncadd (%p1051_p12), %s185_s22, 4294967168 }
  0x2f   : > { %942 = dma.done.wait (%p41_p1), [#allocation6], 16384  }
  0x30   : > { %944 = vsyncadd (%p41_p1), [#allocation6], 4294950912  ;;  %v357_v0 = vld [vmem:[#allocation7 + $0xf0] sm:$0xff]  ;;  %v358_v1 = vld [vmem:[#allocation7 + $0xf8] sm:$0xff]  ;;  %vm229_vm0 = vcmask 1043456   ;;  %s725_s20 = sshll.u32 %s1013_s19, 3 }
  0x31   : > { %v355_v2 = vld [vmem:[#allocation7 + $0xe0] sm:$0xff]  ;;  %391 = vmatpush.msra.mxu0 %v357_v0  ;;  %431 = vmatpush.msra.mxu2 %v358_v1  ;;  %v389_v3 = vld [vmem:[#allocation7 + $0x1f0] sm:$0xff]  ;;  %v356_v4 = vld [vmem:[#allocation7 + $0xe8] sm:$0xff]  ;;  %s610_s25 = scalar_lea.hbm %s1154_s3, %s725_s20  ;;  %s221_s26 = scalar_lea.vmem [#allocation8], %s713_s21 }
  0x32   : > { %v390_v5 = vld [vmem:[#allocation7 + $0x1f8] sm:$0xff]  ;;  %411 = vmatpush.msra.mxu1 %v389_v3  ;;  %v353_v6 = vld [vmem:[#allocation7 + $0xd0] sm:$0xff]  ;;  %v387_v7 = vld [vmem:[#allocation7 + $0x1e0] sm:$0xff]  ;;  %s612_s19 = sshll.u32 %s221_s26, 4  ;;  %s614_s27 = sshll.u32 %s610_s25, 4  ;;  %s613_s19 = int_to_ptr.vmem [resolvable:$true] %s612_s19  ;;  %s615_s27 = int_to_ptr.hbm [resolvable:$true] %s614_s27 }
  0x33   : > { %451 = vmatpush.msra.mxu3 %v390_v5  ;;  %v354_v8 = vld [vmem:[#allocation7 + $0xd8] sm:$0xff]  ;;  %392 = vmatpush.msra.mxu0 %v355_v2  ;;  %v388_v9 = vld [vmem:[#allocation7 + $0x1e8] sm:$0xff]  ;;  %v385_v10 = vld [vmem:[#allocation7 + $0x1d0] sm:$0xff]  ;;  %s599_s28 = scalar_lea.sflag [#allocation4], %s1089_s10  ;;  %s907_s29 = sshra.s32 %s615_s27, 4  ;;  %s908_s29 = int_to_ptr.hbm [resolvable:$true] %s907_s29 }
  0x34   : > { %432 = vmatpush.msra.mxu2 %v356_v4  ;;  %412 = vmatpush.msra.mxu1 %v387_v7  ;;  %v351_v11 = vld [vmem:[#allocation7 + $0xc0] sm:$0xff]  ;;  %v352_v12 = vld [vmem:[#allocation7 + $0xc8] sm:$0xff]  ;;  %v386_v13 = vld [vmem:[#allocation7 + $0x1d8] sm:$0xff]  ;;  %s909_s30 = scalar_lea.hbm %s908_s29, 8  ;;  %s913_s17 = scalar_lea.hbm %s1154_s3, 16 }
  0x35   : > { %452 = vmatpush.msra.mxu3 %v388_v9  ;;  %393 = vmatpush.msra.mxu0 %v353_v6  ;;  %v383_v14 = vld [vmem:[#allocation7 + $0x1c0] sm:$0xff]  ;;  %v384_v15 = vld [vmem:[#allocation7 + $0x1c8] sm:$0xff]  ;;  %v349_v16 = vld [vmem:[#allocation7 + $0xb0] sm:$0xff]  ;;  %p910_p1 = scmp.ne.s32.totalorder %s908_s29, %s909_s30  ;;  %p914_p12 = scmp.lt.s32.totalorder %s908_s29, %s1154_s3 }
  0x36   : > { %433 = vmatpush.msra.mxu2 %v354_v8  ;;  %413 = vmatpush.msra.mxu1 %v385_v10  ;;  %v350_v17 = vld [vmem:[#allocation7 + $0xb8] sm:$0xff]  ;;  %v381_v18 = vld [vmem:[#allocation7 + $0x1b0] sm:$0xff]  ;;  %v347_v20 = vld [vmem:[#allocation7 + $0xa0] sm:$0xff]  ;;  %p915_p7 = scmp.lt.s32.totalorder %s913_s17, %s909_s30 }
  0x37   : > { %453 = vmatpush.msra.mxu3 %v386_v13  ;;  %394 = vmatpush.msra.mxu0 %v351_v11  ;;  %v382_v19 = vld [vmem:[#allocation7 + $0x1b8] sm:$0xff]  ;;  %v348_v21 = vld [vmem:[#allocation7 + $0xa8] sm:$0xff]  ;;  %v379_v22 = vld [vmem:[#allocation7 + $0x1a0] sm:$0xff]  ;;  %p911_p3 = pnand %p910_p1, %p1058_p4 }
  0x38   : > { %434 = vmatpush.msra.mxu2 %v352_v12  ;;  %414 = vmatpush.msra.mxu1 %v383_v14  ;;  %v380_v23 = vld [vmem:[#allocation7 + $0x1a8] sm:$0xff]  ;;  %v345_v24 = vld [vmem:[#allocation7 + $0x90] sm:$0xff]  ;;  %v346_v25 = vld [vmem:[#allocation7 + $0x98] sm:$0xff]  ;;  %p916_p8 = por %p915_p7, %p914_p12 }
  0x39   : > { %454 = vmatpush.msra.mxu3 %v384_v15  ;;  %395 = vmatpush.msra.mxu0 %v349_v16  ;;  %v377_v26 = vld [vmem:[#allocation7 + $0x190] sm:$0xff]  ;;  %v378_v27 = vld [vmem:[#allocation7 + $0x198] sm:$0xff]  ;;  %v343_v28 = vld [vmem:[#allocation7 + $0x80] sm:$0xff]  ;;  %p912_p5 = pneg %p911_p3 }
  0x3a   : > { %435 = vmatpush.msra.mxu2 %v350_v17  ;;  %415 = vmatpush.msra.mxu1 %v381_v18  ;;  %v344_v29 = vld [vmem:[#allocation7 + $0x88] sm:$0xff]  ;;  %v375_v30 = vld [vmem:[#allocation7 + $0x180] sm:$0xff]  ;;  %v341_v32 = vld [vmem:[#allocation7 + $0x70] sm:$0xff] }
  0x3b   : > { %455 = vmatpush.msra.mxu3 %v382_v19  ;;  %396 = vmatpush.msra.mxu0 %v347_v20  ;;  %v376_v31 = vld [vmem:[#allocation7 + $0x188] sm:$0xff]  ;;  %v342_v33 = vld [vmem:[#allocation7 + $0x78] sm:$0xff]  ;;  %v373_v34 = vld [vmem:[#allocation7 + $0x170] sm:$0xff]  ;;  %p917_p9 = pnand %p916_p8, %p912_p5 }
  0x3c   : > { %436 = vmatpush.msra.mxu2 %v348_v21  ;;  %416 = vmatpush.msra.mxu1 %v379_v22  ;;  %v374_v35 = vld [vmem:[#allocation7 + $0x178] sm:$0xff]  ;;  %v339_v36 = vld [vmem:[#allocation7 + $0x60] sm:$0xff]  ;;  %v340_v37 = vld [vmem:[#allocation7 + $0x68] sm:$0xff] }
  0x3d   : > { %456 = vmatpush.msra.mxu3 %v380_v23  ;;  %397 = vmatpush.msra.mxu0 %v345_v24  ;;  %v371_v38 = vld [vmem:[#allocation7 + $0x160] sm:$0xff]  ;;  %v372_v39 = vld [vmem:[#allocation7 + $0x168] sm:$0xff]  ;;  %v337_v40 = vld [vmem:[#allocation7 + $0x50] sm:$0xff] }
  0x3e   : > { %437 = vmatpush.msra.mxu2 %v346_v25  ;;  %417 = vmatpush.msra.mxu1 %v377_v26  ;;  %v338_v41 = vld [vmem:[#allocation7 + $0x58] sm:$0xff]  ;;  %v369_v42 = vld [vmem:[#allocation7 + $0x150] sm:$0xff]  ;;  %v335_v44 = vld [vmem:[#allocation7 + $0x40] sm:$0xff] }
  0x3f   : > { %457 = vmatpush.msra.mxu3 %v378_v27  ;;  %398 = vmatpush.msra.mxu0 %v343_v28  ;;  %v370_v43 = vld [vmem:[#allocation7 + $0x158] sm:$0xff]  ;;  %v336_v45 = vld [vmem:[#allocation7 + $0x48] sm:$0xff]  ;;  %v367_v46 = vld [vmem:[#allocation7 + $0x140] sm:$0xff] }
  0x40   : > { %438 = vmatpush.msra.mxu2 %v344_v29  ;;  %418 = vmatpush.msra.mxu1 %v375_v30  ;;  %v368_v47 = vld [vmem:[#allocation7 + $0x148] sm:$0xff]  ;;  %v333_v48 = vld [vmem:[#allocation7 + $0x30] sm:$0xff]  ;;  %v334_v49 = vld [vmem:[#allocation7 + $0x38] sm:$0xff] }
  0x41   : > { %458 = vmatpush.msra.mxu3 %v376_v31  ;;  %399 = vmatpush.msra.mxu0 %v341_v32  ;;  %v365_v50 = vld [vmem:[#allocation7 + $0x130] sm:$0xff]  ;;  %v366_v51 = vld [vmem:[#allocation7 + $0x138] sm:$0xff]  ;;  %v331_v52 = vld [vmem:[#allocation7 + $0x20] sm:$0xff] }
  0x42   : > { %439 = vmatpush.msra.mxu2 %v342_v33  ;;  %419 = vmatpush.msra.mxu1 %v373_v34  ;;  %v332_v53 = vld [vmem:[#allocation7 + $0x28] sm:$0xff]  ;;  %v363_v54 = vld [vmem:[#allocation7 + $0x120] sm:$0xff]  ;;  %v329_v56 = vld [vmem:[#allocation7 + $0x10] sm:$0xff] }
  0x43   : > { %459 = vmatpush.msra.mxu3 %v374_v35  ;;  %400 = vmatpush.msra.mxu0 %v339_v36  ;;  %v364_v55 = vld [vmem:[#allocation7 + $0x128] sm:$0xff]  ;;  %v330_v57 = vld [vmem:[#allocation7 + $0x18] sm:$0xff]  ;;  %v361_v58 = vld [vmem:[#allocation7 + $0x110] sm:$0xff] }
  0x44   : > { %440 = vmatpush.msra.mxu2 %v340_v37  ;;  %420 = vmatpush.msra.mxu1 %v371_v38  ;;  %v362_v59 = vld [vmem:[#allocation7 + $0x118] sm:$0xff]  ;;  %v327_v60 = vld [vmem:[#allocation7] sm:$0xff]  ;;  %v328_v61 = vld [vmem:[#allocation7 + $0x8] sm:$0xff] }
  0x45   : > { %460 = vmatpush.msra.mxu3 %v372_v39  ;;  %401 = vmatpush.msra.mxu0 %v337_v40  ;;  %v293_v62 = vld [vmem:[#allocation5 + $0xf0] sm:$0xff]  ;;  %v294_v63 = vld [vmem:[#allocation5 + $0xf8] sm:$0xff]  ;;  %v359_v0 = vld [vmem:[#allocation7 + $0x100] sm:$0xff] }
  0x46   : > { %441 = vmatpush.msra.mxu2 %v338_v41  ;;  %421 = vmatpush.msra.mxu1 %v369_v42  ;;  %v360_v1 = vld [vmem:[#allocation7 + $0x108] sm:$0xff]  ;;  %v291_v2 = vld [vmem:[#allocation5 + $0xe0] sm:$0xff]  ;;  %v325_v3 = vld [vmem:[#allocation5 + $0x1f0] sm:$0xff] }
  0x47   : > { %461 = vmatpush.msra.mxu3 %v370_v43  ;;  %402 = vmatpush.msra.mxu0 %v335_v44  ;;  %v292_v4 = vld [vmem:[#allocation5 + $0xe8] sm:$0xff]  ;;  %v326_v5 = vld [vmem:[#allocation5 + $0x1f8] sm:$0xff]  ;;  %v289_v6 = vld [vmem:[#allocation5 + $0xd0] sm:$0xff] }
  0x48   : > { %442 = vmatpush.msra.mxu2 %v336_v45  ;;  %422 = vmatpush.msra.mxu1 %v367_v46  ;;  %v323_v7 = vld [vmem:[#allocation5 + $0x1e0] sm:$0xff]  ;;  %v290_v8 = vld [vmem:[#allocation5 + $0xd8] sm:$0xff]  ;;  %v324_v9 = vld [vmem:[#allocation5 + $0x1e8] sm:$0xff] }
  0x49   : > { %462 = vmatpush.msra.mxu3 %v368_v47  ;;  %403 = vmatpush.msra.mxu0 %v333_v48  ;;  %v287_v10 = vld [vmem:[#allocation5 + $0xc0] sm:$0xff]  ;;  %v321_v11 = vld [vmem:[#allocation5 + $0x1d0] sm:$0xff]  ;;  %v288_v12 = vld [vmem:[#allocation5 + $0xc8] sm:$0xff] }
  0x4a   : > { %443 = vmatpush.msra.mxu2 %v334_v49  ;;  %423 = vmatpush.msra.mxu1 %v365_v50  ;;  %v322_v13 = vld [vmem:[#allocation5 + $0x1d8] sm:$0xff]  ;;  %v285_v15 = vld [vmem:[#allocation5 + $0xb0] sm:$0xff]  ;;  %v319_v16 = vld [vmem:[#allocation5 + $0x1c0] sm:$0xff] }
  0x4b   : > { %463 = vmatpush.msra.mxu3 %v366_v51  ;;  %404 = vmatpush.msra.mxu0 %v331_v52  ;;  %v1106_v14 = vld [vmem:[%s1095_s23] sm:$0xff]  ;;  %v320_v18 = vld [vmem:[#allocation5 + $0x1c8] sm:$0xff]  ;;  %v283_v19 = vld [vmem:[#allocation5 + $0xa0] sm:$0xff] }
  0x4c   : > { %444 = vmatpush.msra.mxu2 %v332_v53  ;;  %424 = vmatpush.msra.mxu1 %v363_v54  ;;  %224 = vst [vmem:[#allocation1] ss:$2 sm:$0xff] %v1106_v14  ;;  %v286_v17 = vld [vmem:[#allocation5 + $0xb8] sm:$0xff]  ;;  %v317_v20 = vld [vmem:[#allocation5 + $0x1b0] sm:$0xff]  ;;  %v284_v21 = vld [vmem:[#allocation5 + $0xa8] sm:$0xff] }
  0x4d   : > { %464 = vmatpush.msra.mxu3 %v364_v55  ;;  %405 = vmatpush.msra.mxu0 %v329_v56  ;;  %v318_v22 = vld [vmem:[#allocation5 + $0x1b8] sm:$0xff]  ;;  %v281_v23 = vld [vmem:[#allocation5 + $0x90] sm:$0xff]  ;;  %v315_v24 = vld [vmem:[#allocation5 + $0x1a0] sm:$0xff] }
  0x4e   : > { %445 = vmatpush.msra.mxu2 %v330_v57  ;;  %425 = vmatpush.msra.mxu1 %v361_v58  ;;  %v282_v25 = vld [vmem:[#allocation5 + $0x98] sm:$0xff]  ;;  %v316_v26 = vld [vmem:[#allocation5 + $0x1a8] sm:$0xff]  ;;  %v279_v27 = vld [vmem:[#allocation5 + $0x80] sm:$0xff] }
  0x4f   : > { %465 = vmatpush.msra.mxu3 %v362_v59  ;;  %406 = vmatpush.msra.mxu0 %v327_v60  ;;  %v313_v28 = vld [vmem:[#allocation5 + $0x190] sm:$0xff]  ;;  %v280_v29 = vld [vmem:[#allocation5 + $0x88] sm:$0xff]  ;;  %v314_v30 = vld [vmem:[#allocation5 + $0x198] sm:$0xff] }
  0x50   : > { %446 = vmatpush.msra.mxu2 %v328_v61  ;;  %426 = vmatpush.msra.mxu1 %v359_v0  ;;  %v277_v33 = vld [vmem:[#allocation5 + $0x70] sm:$0xff]  ;;  %v311_v34 = vld [vmem:[#allocation5 + $0x180] sm:$0xff]  ;;  %v278_v35 = vld [vmem:[#allocation5 + $0x78] sm:$0xff] }
  0x51   : > { %471 = vmatpush.msrb.mxu0 %v293_v62  ;;  %466 = vmatpush.msra.mxu3 %v360_v1  ;;  %v312_v36 = vld [vmem:[#allocation5 + $0x188] sm:$0xff]  ;;  %v275_v37 = vld [vmem:[#allocation5 + $0x60] sm:$0xff]  ;;  %v309_v38 = vld [vmem:[#allocation5 + $0x170] sm:$0xff] }
  0x52   : > { %511 = vmatpush.msrb.mxu2 %v294_v63  ;;  %491 = vmatpush.msrb.mxu1 %v325_v3  ;;  %v276_v40 = vld [vmem:[#allocation5 + $0x68] sm:$0xff]  ;;  %v310_v41 = vld [vmem:[#allocation5 + $0x178] sm:$0xff]  ;;  %v273_v43 = vld [vmem:[#allocation5 + $0x50] sm:$0xff] }
  0x53   : > { %472 = vmatpush.msrb.mxu0 %v291_v2  ;;  %531 = vmatpush.msrb.mxu3 %v326_v5  ;;  %v225_v31 = vld.sshfl [vmem:[#allocation1] sm:$0xff pattern:$0x75316420]  ;;  %v226_v32 = vld.sshfl [vmem:[#allocation1 + $0x8] sm:$0xff pattern:$0x75316420] }
  0x54   : > { %512 = vmatpush.msrb.mxu2 %v292_v4  ;;  %492 = vmatpush.msrb.mxu1 %v323_v7  ;;  %244 = vst [vmem:[#allocation1] ss:$2 sm:$0xff] %v1106_v14  ;;  %v230_v39 = vsel %vm229_vm0, %v225_v31, 0.0  ;;  %v237_v42 = vsel %vm229_vm0, %v226_v32, 0.0  ;;  %v307_v44 = vld [vmem:[#allocation5 + $0x160] sm:$0xff]  ;;  %v274_v45 = vld [vmem:[#allocation5 + $0x58] sm:$0xff] }
  0x55   : > { %473 = vmatpush.msrb.mxu0 %v289_v6  ;;  %532 = vmatpush.msrb.mxu3 %v324_v9  ;;  %v308_v46 = vld [vmem:[#allocation5 + $0x168] sm:$0xff]  ;;  %v271_v47 = vld [vmem:[#allocation5 + $0x40] sm:$0xff]  ;;  %v231_v48 = vrot.slane %v230_v39, 4  ;;  %v305_v49 = vld [vmem:[#allocation5 + $0x150] sm:$0xff]  ;;  %v238_v52 = vrot.slane %v237_v42, 4 }
  0x56   : > { %513 = vmatpush.msrb.mxu2 %v290_v8  ;;  %493 = vmatpush.msrb.mxu1 %v321_v11  ;;  %v272_v50 = vld [vmem:[#allocation5 + $0x48] sm:$0xff]  ;;  %v306_v51 = vld [vmem:[#allocation5 + $0x158] sm:$0xff]  ;;  %v269_v57 = vld [vmem:[#allocation5 + $0x30] sm:$0xff] }
  0x57   : > { %474 = vmatpush.msrb.mxu0 %v287_v10  ;;  %533 = vmatpush.msrb.mxu3 %v322_v13  ;;  %v303_v58 = vld [vmem:[#allocation5 + $0x140] sm:$0xff]  ;;  %v270_v61 = vld [vmem:[#allocation5 + $0x38] sm:$0xff]  ;;  %v304_v62 = vld [vmem:[#allocation5 + $0x148] sm:$0xff]  ;;  %v232_v63 = vadd.f32 %v231_v48, %v230_v39  ;;  %v239_v2 = vadd.f32 %v238_v52, %v237_v42 }
  0x58   : > { %514 = vmatpush.msrb.mxu2 %v288_v12  ;;  %494 = vmatpush.msrb.mxu1 %v319_v16  ;;  %v267_v0 = vld [vmem:[#allocation5 + $0x20] sm:$0xff]  ;;  %v301_v1 = vld [vmem:[#allocation5 + $0x130] sm:$0xff]  ;;  %v268_v5 = vld [vmem:[#allocation5 + $0x28] sm:$0xff] }
  0x59   : > { %475 = vmatpush.msrb.mxu0 %v285_v15  ;;  %534 = vmatpush.msrb.mxu3 %v320_v18  ;;  %v302_v6 = vld [vmem:[#allocation5 + $0x138] sm:$0xff]  ;;  %v265_v7 = vld [vmem:[#allocation5 + $0x10] sm:$0xff]  ;;  %v299_v8 = vld [vmem:[#allocation5 + $0x120] sm:$0xff]  ;;  %v233_v13 = vrot.slane %v232_v63, 2 }
  0x5a   : > { %515 = vmatpush.msrb.mxu2 %v286_v17  ;;  %495 = vmatpush.msrb.mxu1 %v317_v20  ;;  %v266_v11 = vld [vmem:[#allocation5 + $0x18] sm:$0xff]  ;;  %v300_v12 = vld [vmem:[#allocation5 + $0x128] sm:$0xff]  ;;  %v263_v15 = vld [vmem:[#allocation5] sm:$0xff]  ;;  %v240_v17 = vrot.slane %v239_v2, 2 }
  0x5b   : > { %476 = vmatpush.msrb.mxu0 %v283_v19  ;;  %535 = vmatpush.msrb.mxu3 %v318_v22  ;;  %v245_v53 = vld.sshfl [vmem:[#allocation1] sm:$0xff pattern:$0x75316420]  ;;  %v246_v54 = vld.sshfl [vmem:[#allocation1 + $0x8] sm:$0xff pattern:$0x75316420] }
  0x5c   : > { %516 = vmatpush.msrb.mxu2 %v284_v21  ;;  %496 = vmatpush.msrb.mxu1 %v315_v24  ;;  %v249_v55 = vsel %vm229_vm0, %v245_v53, -inf  ;;  %v256_v56 = vsel %vm229_vm0, %v246_v54, -inf  ;;  %v297_v16 = vld [vmem:[#allocation5 + $0x110] sm:$0xff]  ;;  %v264_v20 = vld [vmem:[#allocation5 + $0x8] sm:$0xff]  ;;  %v298_v21 = vld [vmem:[#allocation5 + $0x118] sm:$0xff] }
  0x5d   : > { %477 = vmatpush.msrb.mxu0 %v281_v23  ;;  %536 = vmatpush.msrb.mxu3 %v316_v26  ;;  %v250_v59 = vrot.slane %v249_v55, 4  ;;  %v257_v60 = vrot.slane %v256_v56, 4  ;;  %v295_v22 = vld [vmem:[#allocation5 + $0x100] sm:$0xff]  ;;  %v296_v26 = vld [vmem:[#allocation5 + $0x108] sm:$0xff] }
  0x5e   : > { %517 = vmatpush.msrb.mxu2 %v282_v25  ;;  %497 = vmatpush.msrb.mxu1 %v313_v28  ;;  %v234_v25 = vadd.f32 %v233_v13, %v232_v63 }
  0x5f   : > { %478 = vmatpush.msrb.mxu0 %v279_v27  ;;  %537 = vmatpush.msrb.mxu3 %v314_v30  ;;  %v251_v3 = vmax.f32 %v249_v55, %v250_v59  ;;  %v258_v4 = vmax.f32 %v256_v56, %v257_v60  ;;  %v241_v27 = vadd.f32 %v240_v17, %v239_v2 }
  0x60   : > { %518 = vmatpush.msrb.mxu2 %v280_v29  ;;  %498 = vmatpush.msrb.mxu1 %v311_v34  ;;  %v235_v30 = vrot.slane %v234_v25, 1 }
  0x61   : > { %479 = vmatpush.msrb.mxu0 %v277_v33  ;;  %538 = vmatpush.msrb.mxu3 %v312_v36  ;;  %v252_v9 = vrot.slane %v251_v3, 2  ;;  %v259_v10 = vrot.slane %v258_v4, 2  ;;  %v242_v31 = vrot.slane %v241_v27, 1 }
  0x62   : > { %519 = vmatpush.msrb.mxu2 %v278_v35  ;;  %499 = vmatpush.msrb.mxu1 %v309_v38  ;;  %v236_v32 = vadd.f32 %v235_v30, %v234_v25 }
  0x63   : > { %480 = vmatpush.msrb.mxu0 %v275_v37  ;;  %539 = vmatpush.msrb.mxu3 %v310_v41  ;;  %v253_v18 = vmax.f32 %v251_v3, %v252_v9  ;;  %v260_v19 = vmax.f32 %v258_v4, %v259_v10  ;;  %v243_v33 = vadd.f32 %v242_v31, %v241_v27 }
  0x64   : > { %520 = vmatpush.msrb.mxu2 %v276_v40  ;;  %500 = vmatpush.msrb.mxu1 %v307_v44 }
  0x65   : > { %481 = vmatpush.msrb.mxu0 %v273_v43  ;;  %540 = vmatpush.msrb.mxu3 %v308_v46  ;;  %v254_v23 = vrot.slane %v253_v18, 1  ;;  %v261_v24 = vrot.slane %v260_v19, 1 }
  0x66   : > { %521 = vmatpush.msrb.mxu2 %v274_v45  ;;  %501 = vmatpush.msrb.mxu1 %v305_v49 }
  0x67   : > { %482 = vmatpush.msrb.mxu0 %v271_v47  ;;  %541 = vmatpush.msrb.mxu3 %v306_v51  ;;  %v255_v28 = vmax.f32 %v253_v18, %v254_v23  ;;  %v262_v29 = vmax.f32 %v260_v19, %v261_v24 }
  0x68   : > { %522 = vmatpush.msrb.mxu2 %v272_v50  ;;  %502 = vmatpush.msrb.mxu1 %v303_v58 }
  0x69   : > { %483 = vmatpush.msrb.mxu0 %v269_v57  ;;  %542 = vmatpush.msrb.mxu3 %v304_v62 }
  0x6a   : > { %523 = vmatpush.msrb.mxu2 %v270_v61  ;;  %503 = vmatpush.msrb.mxu1 %v301_v1 }
  0x6b   : > { %484 = vmatpush.msrb.mxu0 %v267_v0  ;;  %543 = vmatpush.msrb.mxu3 %v302_v6 }
  0x6c   : > { %524 = vmatpush.msrb.mxu2 %v268_v5  ;;  %504 = vmatpush.msrb.mxu1 %v299_v8 }
  0x6d   : > { %485 = vmatpush.msrb.mxu0 %v265_v7  ;;  %544 = vmatpush.msrb.mxu3 %v300_v12 }
  0x6e   : > { %525 = vmatpush.msrb.mxu2 %v266_v11  ;;  %505 = vmatpush.msrb.mxu1 %v297_v16 }
  0x6f   : > { %486 = vmatpush.msrb.mxu0 %v263_v15  ;;  %545 = vmatpush.msrb.mxu3 %v298_v21 }
  0x70   : > { %526 = vmatpush.msrb.mxu2 %v264_v20  ;;  %506 = vmatpush.msrb.mxu1 %v295_v22 }
  0x71   : > { %546 = vmatpush.msrb.mxu3 %v296_v26  ;;  %407 = vmatmul.f32.vlgmr.msra.gmra.mxu0 %v255_v28 }
  0x72   : > { %447 = vmatmul.f32.vlgmr.msra.gmra.mxu2 %v255_v28  ;;  %467 = vmatmul.f32.vlgmr.msra.gmra.mxu3 %v262_v29 }
  0x73   : > { %427 = vmatmul.f32.vlgmr.msra.gmra.mxu1 %v262_v29 }
  0x79   : > { %487 = vmatmul.f32.vlgmr.msrb.gmra.mxu0 %v236_v32 }
  0x7a   : > { %527 = vmatmul.f32.vlgmr.msrb.gmra.mxu2 %v236_v32  ;;  %547 = vmatmul.f32.vlgmr.msrb.gmra.mxu3 %v243_v33 }
  0x7b   : > { %507 = vmatmul.f32.vlgmr.msrb.gmra.mxu1 %v243_v33 }
  0xee   : > { %v408_v34 = vpop.f32.mrf.mxu0 }
  0xf0   : > { %v428_v35 = vpop.f32.mrf.mxu1 }
  0xf1   : > { %v429_v36 = vadd.f32 %v428_v35, %v408_v34 }
  0xf5   : > { %v448_v37 = vpop.f32.mrf.mxu2  ;;  %v468_v38 = vpop.f32.mrf.mxu3 }
  0xf6   : > { %v488_v39 = vpop.f32.mrf.mxu0  ;;  %v469_v43 = vadd.f32 %v468_v38, %v448_v37 }
  0xf7   : > { %v489_v40 = vadd.f32 %v488_v39, %v429_v36 }
  0xf8   : > { %v508_v41 = vpop.f32.mrf.mxu1 }
  0xf9   : > { %v509_v42 = vadd.f32 %v508_v41, %v489_v40 }
  0xfb   : > { %v717_v44 = vmul.f32 -1.442695, %v509_v42 }
  0xfd   : > { %v528_v45 = vpop.f32.mrf.mxu2  ;;  %795 = vpow2.f32 %v717_v44  ;;  %v548_v47 = vpop.f32.mrf.mxu3 }
  0xfe   : > { %v529_v46 = vadd.f32 %v528_v45, %v469_v43 }
 0x100   : > { %v549_v48 = vadd.f32 %v548_v47, %v529_v46 }
 0x102   : > { %v718_v49 = vmul.f32 -1.442695, %v549_v48 }
 0x103   : > { %v796_v50 = vpop.eup %795 }
 0x104   : > { %797 = vpow2.f32 %v718_v49  ;;  %v557_v51 = vadd.f32 1.0, %v796_v50 }
 0x106   : > { %799 = vrcp.f32 %v557_v51  ;;  %vm564_vm2 = vweird.f32 %v557_v51  ;;  %v570_v62 = vand.u32 2147483648, %v557_v51  ;;  %v568_v0 = vand.u32 2147483647, %v557_v51 }
 0x108   : > { %v571_v5 = vor.u32 1.1754944e-38, %v570_v62  ;;  %vm569_vm7 = vcmp.eq.f32.partialorder %v568_v0, 8.507059e+37 }
 0x10a   : > { %v798_v52 = vpop.eup %797 }
 0x10b   : > { %v558_v53 = vadd.f32 1.0, %v798_v52 }
 0x10c   : > { %v800_v54 = vpop.eup %799 }
 0x10d   : > { %801 = vrcp.f32 %v558_v53  ;;  %v560_v55 = vmul.f32 %v800_v54, %v557_v51  ;;  %vm565_vm1 = vweird.f32 %v800_v54  ;;  %v585_v63 = vand.u32 2147483648, %v558_v53 }
 0x10e   : > { %v583_v2 = vand.u32 2147483647, %v558_v53  ;;  %vm566_vm4 = vmor %vm564_vm2, %vm565_vm1  ;;  %vm579_vm5 = vweird.f32 %v558_v53 }
 0x10f   : > { %v561_v56 = vsub.f32 1.0, %v560_v55  ;;  %v586_v6 = vor.u32 1.1754944e-38, %v585_v63 }
 0x110   : > { %vm584_vm8 = vcmp.eq.f32.partialorder %v583_v2, 8.507059e+37 }
 0x111   : > { %v562_v57 = vmul.f32 %v800_v54, %v561_v56 }
 0x113   : > { %v802_v58 = vpop.eup %801  ;;  %v563_v60 = vadd.f32 %v800_v54, %v562_v57 }
 0x114   : > { %v575_v59 = vmul.f32 %v802_v58, %v558_v53  ;;  %vm580_vm3 = vweird.f32 %v802_v58 }
 0x115   : > { %v567_v4 = vsel %vm566_vm4, %v800_v54, %v563_v60  ;;  %vm581_vm6 = vmor %vm579_vm5, %vm580_vm3 }
 0x116   : > { %v576_v61 = vsub.f32 1.0, %v575_v59  ;;  %v572_v8 = vsel %vm569_vm7, %v571_v5, %v567_v4 }
 0x117   : > { %v589_v11 = vperm.slane %v572_v8, 0 }
 0x118   : > { %v577_v1 = vmul.f32 %v802_v58, %v576_v61 }
 0x11a   : > { %v578_v3 = vadd.f32 %v802_v58, %v577_v1 }
 0x11c   : > { %v582_v7 = vsel %vm581_vm6, %v802_v58, %v578_v3 }
 0x11d   : > { %v587_v9 = vsel %vm584_vm8, %v586_v6, %v582_v7 }
 0x11e   : > { %v590_v10 = vperm.slane %v587_v9, 0 }
 0x120   : > { %v593_v12 = vrot.slane %v590_v10, 4 }
 0x122   : > { %v594_v13 = vsel %vm229_vm0, %v589_v11, %v593_v12 }
 0x123   : > { %v596_v15 = vmul.f32 %v594_v13, %v1106_v14 }
 0x125   : > { %597 = vst [vmem:[%s221_s26] sm:$0xff] %v596_v15 }
 0x126   : > { %920 = shalt.err (!%p917_p9)
}
 0x127   : > { %736 = dma.vmem_to_hbm [thread:$0]  (%p1058_p4), %s613_s19, 128, %s615_s27, %s599_s28  }
 0x128 PF: > { %s626_s10 = sand.u32 1, %s951_s12   ;;  %p1161_p10 = scmp.ge.s32.totalorder %s963_s15, 2 }
 0x129   : > { %s627_s21 = scalar_lea.sflag [#allocation4], %s626_s10 }
 0x12a   : > { %p750_p13 = pnand %p1161_p10, %p1062_p6 }
 0x12c   : > { %p751_p11 = pneg %p750_p13 }
 0x12e   : > { %946 = dma.done.wait (%p751_p11), %s627_s21, 128  }
 0x12f   : > { %948 = vsyncadd (%p751_p11), %s627_s21, 4294967168  ;;  %p17_p0 = scmp.ge.s32.totalorder %s1032_s4, 4   ;;  %s1162_s12 = smov %s955_s13 }
 0x130   : > { %s1163_s13 = smov %s959_s14  ;;  %s1164_s14 = smov %s1043_s7 }
 0x131   : > { %s1165_s15 = smov %s1032_s4  ;;  %19 = sbr.rel (!%p17_p0) target bundleno = 6 (0x6), region = 85 }
 0x136   :  { %633 = vsyncpa [#allocation3], 1 }
 0x137   :  { %635 = vsyncpa [#allocation3 + $0x1], 1 }
 0x138   :  { %636 = vsyncpa [#allocation6], 1 }
 0x139   :  { %637 = vsyncpa [#allocation4], 1 }
 0x13a   :  { %639 = vsyncpa [#allocation4 + $0x1], 1 }

</bundles_post_ra>
